<compile_context>
chip_gen: v7x
topology: tpu7x:2x2x1
jax: 0.10.0
libtpu: 0.0.40
codegen_flags: <defaults>
</compile_context>

<pallas_src>
import functools

import numpy as np
import jax
import jax.numpy as jnp
from jax import lax
from jax.experimental import pallas as pl
from jax.experimental.pallas import tpu as pltpu


def _round_up(v, m):
    return (v + m - 1) // m * m


def _vb_loss_kernel(x_ref, tgt_ref, logw_ref, nll_ref, *, n_valid, tile_n):
    # x_ref:    (TILE_N, C_pad) logits in native dtype (bf16 ok); math done in f32.
    # tgt_ref:  (TILE_N, 1)     int32 class indices.
    # logw_ref: (1, C_pad)      f32 log class weights.
    # nll_ref:  (TILE_N, 1)     f32 per-sample -log prob (0 for batch-padding rows).
    x = x_ref[...].astype(jnp.float32)
    logw = logw_ref[...].astype(jnp.float32)
    tgt = tgt_ref[...]

    tn, c = x.shape
    y = x + logw                                            # weighted logits (broadcast over rows)

    # numerically-stable logsumexp over classes (padded classes carry -inf logits -> exp == 0)
    m = jnp.max(y, axis=-1, keepdims=True)                  # (TILE_N, 1)
    lse = jnp.log(jnp.sum(jnp.exp(y - m), axis=-1, keepdims=True)) + m

    # pick the target's weighted logit with a select (no onehot multiply, no logp materialization)
    col_ids = lax.broadcasted_iota(jnp.int32, (tn, c), 1)
    picked = jnp.sum(jnp.where(col_ids == tgt, y, 0.0), axis=-1, keepdims=True)

    nll = lse - picked                                      # (TILE_N, 1)

    # zero the contribution of batch-padding rows so the wrapper can simply sum / N
    row_ids = lax.broadcasted_iota(jnp.int32, (tn, 1), 0) + pl.program_id(0) * tile_n
    nll_ref[...] = jnp.where(row_ids < n_valid, nll, 0.0)


def vb_loss(x, target, weight=None, *, tile_n=None, vmem_limit_bytes=32 * 1024 * 1024):
    """VBLoss.forward: x (N, C) logits (f32 or bf16), target (N,) int, weight (C,) positive or None."""
    n, c = x.shape

    # ---- lane-dense class axis: pad C to a multiple of 128 ----
    c_pad = max(128, _round_up(c, 128))
    if weight is None:
        logw = jnp.zeros((1, c_pad), jnp.float32)           # weight==1 -> plain cross entropy
    else:
        logw = jnp.log(jnp.asarray(weight, jnp.float32)).reshape(1, c)
        if c_pad != c:
            logw = jnp.pad(logw, ((0, 0), (0, c_pad - c)))
    if c_pad != c:
        x = jnp.pad(x, ((0, 0), (0, c_pad - c)), constant_values=-jnp.inf)

    # ---- batch tiling: biggest tile whose f32 temporaries stay well inside scoped VMEM ----
    if tile_n is None:
        budget = 4 * 1024 * 1024                            # per (TILE_N, C_pad) f32 temporary
        tile_n = budget // (c_pad * 4)
    tile_n = max(16, min(1024, tile_n, _round_up(n, 16)))
    tile_n = _round_up(tile_n, 16)                          # bf16 sublane packing safe
    n_pad = _round_up(n, tile_n)
    if n_pad != n:
        x = jnp.pad(x, ((0, n_pad - n), (0, 0)))
        target = jnp.pad(target, (0, n_pad - n))
    tgt2d = target.reshape(n_pad, 1).astype(jnp.int32)

    num_tiles = n_pad // tile_n
    kernel = functools.partial(_vb_loss_kernel, n_valid=n, tile_n=tile_n)

    per_sample_nll = pl.pallas_call(
        kernel,
        out_shape=jax.ShapeDtypeStruct((n_pad, 1), jnp.float32),
        grid=(num_tiles,),
        in_specs=[
            pl.BlockSpec((tile_n, c_pad), lambda i: (i, 0)),   # logits tile (pipelined, native dtype)
            pl.BlockSpec((tile_n, 1), lambda i: (i, 0)),       # targets tile
            pl.BlockSpec((1, c_pad), lambda i: (0, 0)),        # log-weights (tiny, reused every tile)
        ],
        out_specs=pl.BlockSpec((tile_n, 1), lambda i: (i, 0)), # disjoint per-tile partial outputs
        compiler_params=pltpu.CompilerParams(
            dimension_semantics=("parallel",),                 # batch tiles independent (v7x dual-TC)
            vmem_limit_bytes=vmem_limit_bytes,
        ),
    )(x, tgt2d, logw)

    # final reduction + single divide in the wrapper (padding rows were zeroed in-kernel)
    return jnp.sum(per_sample_nll) / n


if __name__ == "__main__":
    N, C = 40, 10
    key = jax.random.PRNGKey(0)
    kx, kt = jax.random.split(key)

    x = jax.random.normal(kx, (N, C), dtype=jnp.float32)
    target = jax.random.randint(kt, (N,), 0, C, dtype=jnp.int32)

    # deterministic positive per-class weights (prior/variance-style), as the module expects
    weight = jnp.asarray(np.linspace(0.2, 2.0, C), dtype=jnp.float32)

    # --- weighted path (forced small tile so the batch grid + padding paths are exercised) ---
    loss = vb_loss(x, target, weight, tile_n=16)
    jax.block_until_ready(loss)

    # reference: literal replication of VBLoss.forward weight branch
    wexp = jnp.exp(x) * weight
    probs = wexp / jnp.sum(wexp, axis=1, keepdims=True)
    loss_ref = jnp.mean(-jnp.log(probs)[jnp.arange(N), target])
    assert jnp.allclose(loss, loss_ref, rtol=1e-5, atol=1e-5), (loss, loss_ref)

    # --- weight=None path: plain mean cross entropy ---
    loss_ce = vb_loss(x, target, None)
    jax.block_until_ready(loss_ce)
    logp = jax.nn.log_softmax(x, axis=-1)
    loss_ce_ref = jnp.mean(-logp[jnp.arange(N), target])
    assert jnp.allclose(loss_ce, loss_ce_ref, rtol=1e-5, atol=1e-5), (loss_ce, loss_ce_ref)

    # --- bf16 logits: HBM traffic halved, math still f32 in-kernel ---
    x_bf16 = x.astype(jnp.bfloat16)
    loss_bf16 = vb_loss(x_bf16, target, weight, tile_n=16)
    jax.block_until_ready(loss_bf16)
    x_up = x_bf16.astype(jnp.float32)
    wexp_b = jnp.exp(x_up) * weight
    probs_b = wexp_b / jnp.sum(wexp_b, axis=1, keepdims=True)
    loss_bf16_ref = jnp.mean(-jnp.log(probs_b)[jnp.arange(N), target])
    assert jnp.allclose(loss_bf16, loss_bf16_ref, rtol=1e-3, atol=1e-3), (loss_bf16, loss_bf16_ref)

    print("KERNEL_OK")
</pallas_src>

<mosaic_0001>
module attributes {stable_mosaic.version = 11 : i64} {
  func.func @_vb_loss_kernel(%arg0: i32, %arg1: memref<16x128xf32, #tpu.memory_space<vmem>>, %arg2: memref<16x1xi32, #tpu.memory_space<vmem>>, %arg3: memref<1x128xf32, #tpu.memory_space<vmem>>, %arg4: memref<16x1xf32, #tpu.memory_space<vmem>>) attributes {dimension_semantics = [#tpu.dimension_semantics<parallel>], iteration_bounds = array<i64: 3>, scalar_prefetch = 0 : i64, scratch_operands = 0 : i64, tpu.core_type = #tpu.core_type<tc>, window_params = [{transform_indices = @transform_0, window_bounds = array<i64: 16, 128>}, {transform_indices = @transform_1, window_bounds = array<i64: 16, 1>}, {pipeline_mode = #tpu.pipeline_mode<synchronous>, transform_indices = @transform_2, window_bounds = array<i64: 1, 128>}, {transform_indices = @transform_3, window_bounds = array<i64: 16, 1>}]} {
    %c0 = arith.constant 0 : index
    %c0_0 = arith.constant 0 : index
    %0 = vector.load %arg1[%c0, %c0_0] : memref<16x128xf32, #tpu.memory_space<vmem>>, vector<16x128xf32>
    %c0_1 = arith.constant 0 : index
    %c0_2 = arith.constant 0 : index
    %1 = vector.load %arg3[%c0_1, %c0_2] : memref<1x128xf32, #tpu.memory_space<vmem>>, vector<1x128xf32>
    %c0_3 = arith.constant 0 : index
    %c0_4 = arith.constant 0 : index
    %2 = vector.load %arg2[%c0_3, %c0_4] : memref<16x1xi32, #tpu.memory_space<vmem>>, vector<16x1xi32>
    %3 = vector.broadcast %1 : vector<1x128xf32> to vector<16x128xf32>
    %4 = arith.addf %0, %3 : vector<16x128xf32>
    %cst = arith.constant dense<0xFF800000> : vector<16xf32>
    %5 = vector.multi_reduction <maximumf>, %4, %cst [1] : vector<16x128xf32> to vector<16xf32>
    %6 = vector.shape_cast %5 : vector<16xf32> to vector<16x1xf32>
    %7 = vector.broadcast %6 : vector<16x1xf32> to vector<16x128xf32>
    %8 = arith.subf %4, %7 : vector<16x128xf32>
    %9 = math.exp %8 : vector<16x128xf32>
    %cst_5 = arith.constant dense<0.000000e+00> : vector<16xf32>
    %10 = vector.multi_reduction <add>, %9, %cst_5 [1] : vector<16x128xf32> to vector<16xf32>
    %11 = vector.shape_cast %10 : vector<16xf32> to vector<16x1xf32>
    %12 = math.log %11 : vector<16x1xf32>
    %13 = arith.addf %12, %6 : vector<16x1xf32>
    %14 = tpu.iota {dimensions = array<i32: 1>} : vector<16x128xi32>
    %15 = vector.broadcast %2 : vector<16x1xi32> to vector<16x128xi32>
    %16 = arith.cmpi eq, %14, %15 : vector<16x128xi32>
    %cst_6 = arith.constant 0.000000e+00 : f32
    %17 = vector.broadcast %cst_6 : f32 to vector<16x128xf32>
    %18 = arith.select %16, %4, %17 : vector<16x128xi1>, vector<16x128xf32>
    %cst_7 = arith.constant dense<0.000000e+00> : vector<16xf32>
    %19 = vector.multi_reduction <add>, %18, %cst_7 [1] : vector<16x128xf32> to vector<16xf32>
    %20 = vector.shape_cast %19 : vector<16xf32> to vector<16x1xf32>
    %21 = arith.subf %13, %20 : vector<16x1xf32>
    %22 = tpu.iota {dimensions = array<i32: 0>} : vector<16x1xi32>
    %c16_i32 = arith.constant 16 : i32
    %23 = arith.muli %arg0, %c16_i32 : i32
    %24 = vector.broadcast %23 : i32 to vector<16x1xi32>
    %25 = arith.addi %22, %24 : vector<16x1xi32>
    %c40_i32 = arith.constant 40 : i32
    %26 = vector.broadcast %c40_i32 : i32 to vector<16x1xi32>
    %27 = arith.cmpi slt, %25, %26 : vector<16x1xi32>
    %cst_8 = arith.constant 0.000000e+00 : f32
    %28 = vector.broadcast %cst_8 : f32 to vector<16x1xf32>
    %29 = arith.select %27, %21, %28 : vector<16x1xi1>, vector<16x1xf32>
    %c0_9 = arith.constant 0 : index
    %c0_10 = arith.constant 0 : index
    %30 = vector.load %arg4[%c0_9, %c0_10] : memref<16x1xf32, #tpu.memory_space<vmem>>, vector<16x1xf32>
    tpu.vector_store %arg4[%c0_9, %c0_10], %29 {strides = array<i32>} : memref<16x1xf32, #tpu.memory_space<vmem>>, vector<16x1xf32>,
    return
  }
  func.func @transform_0(%arg0: i32) -> (i32, i32) {
    %c0_i32 = arith.constant 0 : i32
    %c0_i32_0 = arith.constant 0 : i32
    return %arg0, %c0_i32 : i32, i32
  }
  func.func @transform_1(%arg0: i32) -> (i32, i32) {
    %c0_i32 = arith.constant 0 : i32
    %c0_i32_0 = arith.constant 0 : i32
    return %arg0, %c0_i32 : i32, i32
  }
  func.func @transform_2(%arg0: i32) -> (i32, i32) {
    %c0_i32 = arith.constant 0 : i32
    %c0_i32_0 = arith.constant 0 : i32
    %c0_i32_1 = arith.constant 0 : i32
    return %c0_i32, %c0_i32_0 : i32, i32
  }
  func.func @transform_3(%arg0: i32) -> (i32, i32) {
    %c0_i32 = arith.constant 0 : i32
    %c0_i32_0 = arith.constant 0 : i32
    return %arg0, %c0_i32 : i32, i32
  }
}

</mosaic_0001>

<bundles_post_ra>
// kernel: tpu_custom_call.1
= control target key start
LH: loop header
LB: loop body
LE: loop exit
PB: predicated region body
PF: predicated region fallthrough
CT: control target
= control target key end

     0   :  { %s392_s12 = smov 0   ;;  %s424_s0 = inlined_call_operand.vmem [shape: f32[48,128], index: 0, kind: input, shape index: {}]   ;;  %s425_s1 = inlined_call_operand.vmem [shape: s32[48,1], index: 1, kind: input, shape index: {}]   ;;  %s426_s2 = inlined_call_operand.vmem [shape: f32[1,128], index: 2, kind: input, shape index: {}]   ;;  %s427_s3 = inlined_call_operand.vmem [shape: f32[48,1], index: 3, kind: output, shape index: {}]  }
   0x1 LB: > { %s329_s13 = sadd.s32 4294967295, %s369_s12   ;;  %p333_p0 = scmp.ge.s32.totalorder %s369_s12, 1  ;;  %s369_s12 = sphi %s392_s12, %s13_s12  }
   0x2   : > { %p149_p1 = scmp.lt.s32.totalorder %s369_s12, 4 }
   0x4   : > { %p150_p2 = pnand %p333_p0, %p149_p1 }
   0x5   : > { %s334_s14 = sshll.u32 (!%p150_p2), %s329_s13, 1  ;;  %v371_v0 = vmov (!%p150_p2), 0   ;;  %v340_v1 = vld [vmem:[%s426_s2] ss:$0 sm:$0xff] (!%p150_p2)  ;;  %v229_v13 = vlaneseq (!%p150_p2)  ;;  %s341_s24 = sshll.u32 (!%p150_p2), %s329_s13, 4  ;;  %vm258_vm3 = vcmask (!%p150_p2), 7168  }
   0x6   : > { %153 = sbr.rel (%p150_p2) target bundleno = 341 (0x155), region = 32  ;;  %p179_p3 = scmp.lt.s32.totalorder (!%p150_p2), %s334_s14, 5  ;;  %353 = vset.pattern.permute.xlu1 (!%p150_p2), %v371_v0  ;;  %354 = vset.pattern.permute.xlu0 (!%p150_p2), %v371_v0  ;;  %v251_v25 = vstv (!%p150_p2), %s341_s24 }
   0x7   : > { %v230_v16 = vand.u32 (!%p150_p2), 127, %v229_v13  ;;  %v248_v24 = vshrl.u32 (!%p150_p2), %v229_v13, 7 }
   0x9   : > { %v252_v27 = vadd.s32 (!%p150_p2), %v251_v25, %v248_v24  ;;  %v249_v28 = vadd.s32 (!%p150_p2), 8, %v248_v24 }
   0xb   : > { %vm254_vm2 = vcmp.lt.s32.totalorder (!%p150_p2), %v252_v27, 40  ;;  %v253_v33 = vadd.s32 (!%p150_p2), %v251_v25, %v249_v28 }
   0xd   : > { %s429_s14 = smov (!%p179_p3, %s334_s14), 5  ;;  %vm255_vm4 = vcmp.lt.s32.totalorder %v253_v33, 40 }
   0xe   : > { %s402_s15 = sshll.u32 %s429_s14, 3 }
   0xf   : > { %s182_s20 = scalar_lea.vmem %s424_s0, %s402_s15  ;;  %s188_s23 = scalar_lea.vmem %s425_s1, %s402_s15 }
  0x10   : > { %v196_v2 = vld [vmem:[%s182_s20] sm:$0xff]  ;;  %v197_v3 = vld [vmem:[%s182_s20 + $0x8] sm:$0xff]  ;;  %s194_s27 = scalar_lea.vmem %s427_s3, %s402_s15 }
  0x11   : > { %v199_v4 = vld [vmem:[%s188_s23] sm:$0xff]  ;;  %v207_v5 = vadd.f32 %v340_v1, %v196_v2  ;;  %v200_v6 = vld [vmem:[%s188_s23 + $0x8] sm:$0xff]  ;;  %v208_v7 = vadd.f32 %v340_v1, %v197_v3 }
  0x12   : > { %232 = vperm.xlu1 %353, %v199_v4  }
  0x13   : > { %209 = vmax.xlane.f32.xlu0 %v207_v5 }
  0x16   : > { %235 = vperm.xlu1 %353, %v200_v6  }
  0x17   : > { %211 = vmax.xlane.f32.xlu0 %v208_v7 }
  0x91   : > { %v233_v15 = vpop.permute.xlu1 %232 }
  0x92   : > { %vm237_vm0 = vcmp.eq.s32.totalorder %v230_v16, %v233_v15 }
  0x93   : > { %v239_v19 = vsel %vm237_vm0, %v207_v5, 0.0 }
  0x95   : > { %v236_v18 = vpop.permute.xlu1 %235 }
  0x96   : > { %vm238_vm1 = vcmp.eq.s32.totalorder %v230_v16, %v236_v18 }
  0x97   : > { %v240_v21 = vsel %vm238_vm1, %v208_v7, 0.0 }
  0xa0   : > { %v210_v8 = vpop.xlane.xlu0 %209 }
  0xa1   : > { %v213_v9 = vsub.f32 %v207_v5, %v210_v8 }
  0xa3   : > { %v215_v10 = vmul.f32 1.442695, %v213_v9 }
  0xa4   : > { %v212_v11 = vpop.xlane.xlu0 %211 }
  0xa5   : > { %355 = vpow2.f32 %v215_v10  ;;  %v214_v12 = vsub.f32 %v208_v7, %v212_v11 }
  0xa7   : > { %v217_v14 = vmul.f32 1.442695, %v214_v12 }
  0xa9   : > { %357 = vpow2.f32 %v217_v14 }
  0xaf   : > { %v356_v17 = vpop.eup %355 }
  0xb0   : > { %219 = vadd.xlane.f32.xlu0 %v356_v17 }
  0xb3   : > { %v358_v20 = vpop.eup %357 }
  0xb4   : > { %221 = vadd.xlane.f32.xlu1 %v358_v20  ;;  %241 = vadd.xlane.f32.xlu0 %v239_v19 }
  0xb8   : > { %243 = vadd.xlane.f32.xlu0 %v240_v21 }
 0x13d   : > { %v220_v22 = vpop.xlane.xlu0 %219 }
 0x13e   : > { %359 = vlog2.f32 %v220_v22 }
 0x141   : > { %v222_v23 = vpop.xlane.xlu1 %221  ;;  %v242_v30 = vpop.xlane.xlu0 %241 }
 0x142   : > { %361 = vlog2.f32 %v222_v23 }
 0x145   : > { %v244_v38 = vpop.xlane.xlu0 %243 }
 0x148   : > { %v360_v26 = vpop.eup %359 }
 0x149   : > { %v224_v29 = vmul.f32 0.6931472, %v360_v26 }
 0x14b   : > { %v227_v31 = vadd.f32 %v224_v29, %v210_v8 }
 0x14c   : > { %v362_v32 = vpop.eup %361 }
 0x14d   : > { %v226_v34 = vmul.f32 0.6931472, %v362_v32  ;;  %v245_v35 = vsub.f32 %v227_v31, %v242_v30 }
 0x14f   : > { %v256_v36 = vsel %vm254_vm2, %v245_v35, 0.0  ;;  %v228_v37 = vadd.f32 %v226_v34, %v212_v11 }
 0x150   : > { %259 = vst.msk [vmem:[%s194_s27] sm:$0xff] %vm258_vm3, %v256_v36 }
 0x151   : > { %v246_v39 = vsub.f32 %v228_v37, %v244_v38 }
 0x153   : > { %v257_v40 = vsel %vm255_vm4, %v246_v39, 0.0 }
 0x154   : > { %260 = vst.msk [vmem:[%s194_s27 + $0x8] sm:$0xff] %vm258_vm3, %v257_v40 }
 0x155 PF: > { %s13_s12 = sadd.s32 1, %s369_s12  }
 0x156   : > { %p10_p4 = scmp.ge.s32.totalorder %s13_s12, 5  }
 0x158   :  { %12 = sbr.rel (!%p10_p4) target bundleno = 1 (0x1), region = 65 }

</bundles_post_ra>
